<compile_context>
chip_gen: v7x
topology: tpu7x:2x2x1
jax: 0.10.0
libtpu: 0.0.40
codegen_flags: <defaults>
</compile_context>

<pallas_src>
import functools

import jax
import jax.numpy as jnp
from jax import lax
from jax.experimental import pallas as pl
from jax.experimental.pallas import tpu as pltpu


def _round_up(n, m):
    return ((n + m - 1) // m) * m


def _rnn_kernel(x_ref, wih_ref, whh_ref, b_ref, wfc_ref, bfc_ref, out_ref, *scratch,
                seq_len, batch_pad, unroll):
    """All refs are whole, padded arrays resident in VMEM.

    x_ref   : (T*Bp, Ip)  time-major inputs, flattened over (t, b)   [f32 or bf16]
    wih_ref : (Ip, Hp)    W_ih^T (zero padded)                        [f32 or bf16]
    whh_ref : (Hp, Hp)    W_hh^T (zero padded)                        [f32]
    b_ref   : (1, Hp)     b_ih + b_hh (zero padded)                   [f32]
    wfc_ref : (Hp, Op)    W_fc^T (zero padded)                        [f32 or bf16]
    bfc_ref : (1, Op)     b_fc (zero padded)                          [f32]
    out_ref : (Bp, Op)    fc(last hidden state)                       [f32]
    scratch : optionally one (T*Bp, Hp) f32 VMEM buffer (long-T path only)
    """
    hidden_pad = whh_ref.shape[0]
    bias = b_ref[...]
    whh = whh_ref[...]            # loaded into vregs once for the whole recurrence
    h0 = jnp.zeros((batch_pad, hidden_pad), jnp.float32)

    if not scratch:
        # --- Small-T path: no scratch round-trip, static slices, full unroll. ---
        # One big, well-shaped MXU matmul for every timestep's input projection.
        xp = jnp.dot(x_ref[...], wih_ref[...],
                     preferred_element_type=jnp.float32) + bias     # (T*Bp, Hp) f32
        h = h0
        for t in range(seq_len):                                    # static indices
            xp_t = xp[t * batch_pad:(t + 1) * batch_pad, :]
            h = jnp.tanh(xp_t + jnp.dot(h, whh,
                                        preferred_element_type=jnp.float32))
        h_last = h
    else:
        # --- Long-T path: hoisted projection lives in a VMEM scratch buffer. ---
        xp_ref = scratch[0]
        xp_ref[...] = jnp.dot(x_ref[...], wih_ref[...],
                              preferred_element_type=jnp.float32) + bias

        def step(t, h):
            start = pl.multiple_of(t * batch_pad, batch_pad)
            xp_t = xp_ref[pl.ds(start, batch_pad), :]
            return jnp.tanh(xp_t + jnp.dot(h, whh,
                                           preferred_element_type=jnp.float32))

        h_last = lax.fori_loop(0, seq_len, step, h0, unroll=unroll)

    # Fused fc on the last hidden state (lane-dense Op output -> unmasked vst).
    h_fc = h_last.astype(wfc_ref.dtype)
    out_ref[...] = (
        jnp.dot(h_fc, wfc_ref[...], preferred_element_type=jnp.float32)
        + bfc_ref[...]
    ).astype(out_ref.dtype)


def simple_rnn_forward(x, w_ih, w_hh, b_ih, b_hh, w_fc, b_fc, *, mxu_bf16=None):
    """x: (B, T, I).  Weights use PyTorch shapes:
       w_ih (H, I), w_hh (H, H), b_ih (H,), b_hh (H,), w_fc (O, H), b_fc (O,)."""
    B, T, I = x.shape
    H = w_hh.shape[0]
    O = w_fc.shape[0]

    # bf16 MXU operands only pay off once the feature dims are non-trivial;
    # at toy sizes keep f32 so the 1e-5 correctness check holds.
    if mxu_bf16 is None:
        mxu_bf16 = max(I, H, O) >= 256

    # Pad batch to a sublane multiple and feature dims to lane multiples.
    Bp = _round_up(max(B, 8), 8)
    Ip = _round_up(I, 128)
    Hp = _round_up(H, 128)
    Op = _round_up(O, 128)

    f32 = jnp.float32
    mxu_dtype = jnp.bfloat16 if mxu_bf16 else f32

    # Time-major, zero-padded, flattened for the hoisted input projection.
    # TODO(synk): for large (B, T) feed x via a BlockSpec index_map over time
    # chunks instead of materializing this padded/transposed copy in the wrapper.
    x_tbi = jnp.transpose(x, (1, 0, 2)).astype(f32)                    # (T, B, I)
    x_pad = jnp.zeros((T, Bp, Ip), f32).at[:, :B, :I].set(x_tbi)
    x_flat = x_pad.reshape(T * Bp, Ip).astype(mxu_dtype)               # (T*Bp, Ip)

    wih_t = jnp.zeros((Ip, Hp), f32).at[:I, :H].set(
        jnp.transpose(w_ih).astype(f32)).astype(mxu_dtype)
    whh_t = jnp.zeros((Hp, Hp), f32).at[:H, :H].set(
        jnp.transpose(w_hh).astype(f32))                               # recurrence stays f32
    b = jnp.zeros((1, Hp), f32).at[0, :H].set((b_ih + b_hh).astype(f32))
    wfc_t = jnp.zeros((Hp, Op), f32).at[:H, :O].set(
        jnp.transpose(w_fc).astype(f32)).astype(mxu_dtype)
    bfc = jnp.zeros((1, Op), f32).at[0, :O].set(b_fc.astype(f32))

    # Small T: xp stays in vregs, fully unrolled.  Large T: VMEM scratch + fori.
    small_t = T <= 16
    unroll = True if small_t else 8
    scratch_shapes = [] if small_t else [pltpu.VMEM((T * Bp, Hp), f32)]

    kernel = functools.partial(_rnn_kernel, seq_len=T, batch_pad=Bp, unroll=unroll)

    # Advisory cost estimate: this call is tiny and launch/DMA-bound.
    ib = 2 if mxu_bf16 else 4
    flops = 2 * (T * Bp * Ip * Hp + T * Bp * Hp * Hp + Bp * Hp * Op)
    transcendentals = T * Bp * Hp
    bytes_accessed = (T * Bp * Ip * ib + Ip * Hp * ib + Hp * Hp * 4 + Hp * 4
                      + Hp * Op * ib + Op * 4 + Bp * Op * 4)
    cost = pl.CostEstimate(flops=flops, transcendentals=transcendentals,
                           bytes_accessed=bytes_accessed)

    out_pad = pl.pallas_call(
        kernel,
        out_shape=jax.ShapeDtypeStruct((Bp, Op), f32),
        in_specs=[pl.BlockSpec(memory_space=pltpu.MemorySpace.VMEM)] * 6,
        out_specs=pl.BlockSpec(memory_space=pltpu.MemorySpace.VMEM),
        scratch_shapes=scratch_shapes,
        compiler_params=pltpu.CompilerParams(vmem_limit_bytes=32 * 1024 * 1024),
        cost_estimate=cost,
    )(x_flat, wih_t, whh_t, b, wfc_t, bfc)

    # Padded batch rows / padded output lanes are never part of the result.
    return out_pad[:B, :O].astype(x.dtype)


def simple_rnn_reference(x, w_ih, w_hh, b_ih, b_hh, w_fc, b_fc):
    """Pure-JAX reference matching torch.nn.RNN(batch_first=True) + Linear."""
    B, T, I = x.shape
    H = w_hh.shape[0]

    def step(h, x_t):
        h_new = jnp.tanh(x_t @ w_ih.T + b_ih + h @ w_hh.T + b_hh)
        return h_new, None

    h0 = jnp.zeros((B, H), jnp.float32)
    h_last, _ = jax.lax.scan(step, h0, jnp.transpose(x, (1, 0, 2)))
    return h_last @ w_fc.T + b_fc


if __name__ == "__main__":
    # Small shapes consistent with the module: x is (batch, seq, input_size).
    B, T, I, H, O = 2, 8, 16, 32, 8

    key = jax.random.PRNGKey(0)
    k_x, k_x2, k_wih, k_whh, k_bih, k_bhh, k_wfc, k_bfc = jax.random.split(key, 8)

    x = jax.random.normal(k_x, (B, T, I), jnp.float32)

    # Deterministic parameter init (PyTorch-style uniform scale).
    s_rnn = 1.0 / jnp.sqrt(H)
    s_fc = 1.0 / jnp.sqrt(H)
    w_ih = jax.random.uniform(k_wih, (H, I), jnp.float32, -s_rnn, s_rnn)
    w_hh = jax.random.uniform(k_whh, (H, H), jnp.float32, -s_rnn, s_rnn)
    b_ih = jax.random.uniform(k_bih, (H,), jnp.float32, -s_rnn, s_rnn)
    b_hh = jax.random.uniform(k_bhh, (H,), jnp.float32, -s_rnn, s_rnn)
    w_fc = jax.random.uniform(k_wfc, (O, H), jnp.float32, -s_fc, s_fc)
    b_fc = jax.random.uniform(k_bfc, (O,), jnp.float32, -s_fc, s_fc)

    # 1) Default (f32, small-T path: no scratch, static slices, full unroll).
    out = jax.block_until_ready(
        simple_rnn_forward(x, w_ih, w_hh, b_ih, b_hh, w_fc, b_fc))
    ref = simple_rnn_reference(x, w_ih, w_hh, b_ih, b_hh, w_fc, b_fc)
    assert out.shape == (B, O)
    assert jnp.allclose(out, ref, atol=1e-5, rtol=1e-5), (out, ref)

    # 2) Long-sequence path (VMEM scratch + fori_loop, bounded unroll).
    T2 = 24
    x2 = jax.random.normal(k_x2, (B, T2, I), jnp.float32)
    out2 = jax.block_until_ready(
        simple_rnn_forward(x2, w_ih, w_hh, b_ih, b_hh, w_fc, b_fc))
    ref2 = simple_rnn_reference(x2, w_ih, w_hh, b_ih, b_hh, w_fc, b_fc)
    assert jnp.allclose(out2, ref2, atol=1e-4, rtol=1e-4), (out2, ref2)

    # 3) bf16 MXU operands on the non-recurrent matmuls (scale option);
    #    looser tolerance because the operands themselves are rounded to bf16.
    out3 = jax.block_until_ready(
        simple_rnn_forward(x, w_ih, w_hh, b_ih, b_hh, w_fc, b_fc, mxu_bf16=True))
    assert jnp.allclose(out3, ref, atol=2e-2, rtol=2e-2), (out3, ref)

    print("KERNEL_OK")
</pallas_src>

<mosaic_0001>
module attributes {stable_mosaic.version = 11 : i64} {
  func.func @_rnn_kernel(%arg0: memref<64x128xf32, #tpu.memory_space<vmem>>, %arg1: memref<128x128xf32, #tpu.memory_space<vmem>>, %arg2: memref<128x128xf32, #tpu.memory_space<vmem>>, %arg3: memref<1x128xf32, #tpu.memory_space<vmem>>, %arg4: memref<128x128xf32, #tpu.memory_space<vmem>>, %arg5: memref<1x128xf32, #tpu.memory_space<vmem>>, %arg6: memref<8x128xf32, #tpu.memory_space<vmem>>) attributes {dimension_semantics = [], scalar_prefetch = 0 : i64, scratch_operands = 0 : i64, tpu.core_type = #tpu.core_type<tc>} {
    %c0 = arith.constant 0 : index
    %c0_0 = arith.constant 0 : index
    %0 = vector.load %arg3[%c0, %c0_0] : memref<1x128xf32, #tpu.memory_space<vmem>>, vector<1x128xf32>
    %c0_1 = arith.constant 0 : index
    %c0_2 = arith.constant 0 : index
    %1 = vector.load %arg2[%c0_1, %c0_2] : memref<128x128xf32, #tpu.memory_space<vmem>>, vector<128x128xf32>
    %cst = arith.constant 0.000000e+00 : f32
    %2 = vector.broadcast %cst : f32 to vector<8x128xf32>
    %c0_3 = arith.constant 0 : index
    %c0_4 = arith.constant 0 : index
    %3 = vector.load %arg0[%c0_3, %c0_4] : memref<64x128xf32, #tpu.memory_space<vmem>>, vector<64x128xf32>
    %c0_5 = arith.constant 0 : index
    %c0_6 = arith.constant 0 : index
    %4 = vector.load %arg1[%c0_5, %c0_6] : memref<128x128xf32, #tpu.memory_space<vmem>>, vector<128x128xf32>
    %cst_7 = arith.constant dense<0.000000e+00> : vector<64x128xf32>
    %5 = tpu.matmul %3, %4, %cst_7 {dimension_numbers = #tpu.dot_dimension_numbers<[1], [0], [0], [1], [0, 0, 1, 1], [], []>} : vector<64x128xf32>, vector<128x128xf32>, vector<64x128xf32> -> vector<64x128xf32>
    %6 = vector.broadcast %0 : vector<1x128xf32> to vector<64x128xf32>
    %7 = arith.addf %5, %6 : vector<64x128xf32>
    %8 = vector.extract_strided_slice %7 {offsets = [0, 0], sizes = [8, 128], strides = [1, 1]} : vector<64x128xf32> to vector<8x128xf32>
    %cst_8 = arith.constant dense<0.000000e+00> : vector<8x128xf32>
    %9 = tpu.matmul %2, %1, %cst_8 {dimension_numbers = #tpu.dot_dimension_numbers<[1], [0], [0], [1], [0, 0, 1, 1], [], []>} : vector<8x128xf32>, vector<128x128xf32>, vector<8x128xf32> -> vector<8x128xf32>
    %10 = arith.addf %8, %9 : vector<8x128xf32>
    %11 = math.tanh %10 : vector<8x128xf32>
    %12 = vector.extract_strided_slice %7 {offsets = [8, 0], sizes = [8, 128], strides = [1, 1]} : vector<64x128xf32> to vector<8x128xf32>
    %cst_9 = arith.constant dense<0.000000e+00> : vector<8x128xf32>
    %13 = tpu.matmul %11, %1, %cst_9 {dimension_numbers = #tpu.dot_dimension_numbers<[1], [0], [0], [1], [0, 0, 1, 1], [], []>} : vector<8x128xf32>, vector<128x128xf32>, vector<8x128xf32> -> vector<8x128xf32>
    %14 = arith.addf %12, %13 : vector<8x128xf32>
    %15 = math.tanh %14 : vector<8x128xf32>
    %16 = vector.extract_strided_slice %7 {offsets = [16, 0], sizes = [8, 128], strides = [1, 1]} : vector<64x128xf32> to vector<8x128xf32>
    %cst_10 = arith.constant dense<0.000000e+00> : vector<8x128xf32>
    %17 = tpu.matmul %15, %1, %cst_10 {dimension_numbers = #tpu.dot_dimension_numbers<[1], [0], [0], [1], [0, 0, 1, 1], [], []>} : vector<8x128xf32>, vector<128x128xf32>, vector<8x128xf32> -> vector<8x128xf32>
    %18 = arith.addf %16, %17 : vector<8x128xf32>
    %19 = math.tanh %18 : vector<8x128xf32>
    %20 = vector.extract_strided_slice %7 {offsets = [24, 0], sizes = [8, 128], strides = [1, 1]} : vector<64x128xf32> to vector<8x128xf32>
    %cst_11 = arith.constant dense<0.000000e+00> : vector<8x128xf32>
    %21 = tpu.matmul %19, %1, %cst_11 {dimension_numbers = #tpu.dot_dimension_numbers<[1], [0], [0], [1], [0, 0, 1, 1], [], []>} : vector<8x128xf32>, vector<128x128xf32>, vector<8x128xf32> -> vector<8x128xf32>
    %22 = arith.addf %20, %21 : vector<8x128xf32>
    %23 = math.tanh %22 : vector<8x128xf32>
    %24 = vector.extract_strided_slice %7 {offsets = [32, 0], sizes = [8, 128], strides = [1, 1]} : vector<64x128xf32> to vector<8x128xf32>
    %cst_12 = arith.constant dense<0.000000e+00> : vector<8x128xf32>
    %25 = tpu.matmul %23, %1, %cst_12 {dimension_numbers = #tpu.dot_dimension_numbers<[1], [0], [0], [1], [0, 0, 1, 1], [], []>} : vector<8x128xf32>, vector<128x128xf32>, vector<8x128xf32> -> vector<8x128xf32>
    %26 = arith.addf %24, %25 : vector<8x128xf32>
    %27 = math.tanh %26 : vector<8x128xf32>
    %28 = vector.extract_strided_slice %7 {offsets = [40, 0], sizes = [8, 128], strides = [1, 1]} : vector<64x128xf32> to vector<8x128xf32>
    %cst_13 = arith.constant dense<0.000000e+00> : vector<8x128xf32>
    %29 = tpu.matmul %27, %1, %cst_13 {dimension_numbers = #tpu.dot_dimension_numbers<[1], [0], [0], [1], [0, 0, 1, 1], [], []>} : vector<8x128xf32>, vector<128x128xf32>, vector<8x128xf32> -> vector<8x128xf32>
    %30 = arith.addf %28, %29 : vector<8x128xf32>
    %31 = math.tanh %30 : vector<8x128xf32>
    %32 = vector.extract_strided_slice %7 {offsets = [48, 0], sizes = [8, 128], strides = [1, 1]} : vector<64x128xf32> to vector<8x128xf32>
    %cst_14 = arith.constant dense<0.000000e+00> : vector<8x128xf32>
    %33 = tpu.matmul %31, %1, %cst_14 {dimension_numbers = #tpu.dot_dimension_numbers<[1], [0], [0], [1], [0, 0, 1, 1], [], []>} : vector<8x128xf32>, vector<128x128xf32>, vector<8x128xf32> -> vector<8x128xf32>
    %34 = arith.addf %32, %33 : vector<8x128xf32>
    %35 = math.tanh %34 : vector<8x128xf32>
    %36 = vector.extract_strided_slice %7 {offsets = [56, 0], sizes = [8, 128], strides = [1, 1]} : vector<64x128xf32> to vector<8x128xf32>
    %cst_15 = arith.constant dense<0.000000e+00> : vector<8x128xf32>
    %37 = tpu.matmul %35, %1, %cst_15 {dimension_numbers = #tpu.dot_dimension_numbers<[1], [0], [0], [1], [0, 0, 1, 1], [], []>} : vector<8x128xf32>, vector<128x128xf32>, vector<8x128xf32> -> vector<8x128xf32>
    %38 = arith.addf %36, %37 : vector<8x128xf32>
    %39 = math.tanh %38 : vector<8x128xf32>
    %c0_16 = arith.constant 0 : index
    %c0_17 = arith.constant 0 : index
    %40 = vector.load %arg4[%c0_16, %c0_17] : memref<128x128xf32, #tpu.memory_space<vmem>>, vector<128x128xf32>
    %cst_18 = arith.constant dense<0.000000e+00> : vector<8x128xf32>
    %41 = tpu.matmul %39, %40, %cst_18 {dimension_numbers = #tpu.dot_dimension_numbers<[1], [0], [0], [1], [0, 0, 1, 1], [], []>} : vector<8x128xf32>, vector<128x128xf32>, vector<8x128xf32> -> vector<8x128xf32>
    %c0_19 = arith.constant 0 : index
    %c0_20 = arith.constant 0 : index
    %42 = vector.load %arg5[%c0_19, %c0_20] : memref<1x128xf32, #tpu.memory_space<vmem>>, vector<1x128xf32>
    %43 = vector.broadcast %42 : vector<1x128xf32> to vector<8x128xf32>
    %44 = arith.addf %41, %43 : vector<8x128xf32>
    %c0_21 = arith.constant 0 : index
    %c0_22 = arith.constant 0 : index
    %45 = vector.load %arg6[%c0_21, %c0_22] : memref<8x128xf32, #tpu.memory_space<vmem>>, vector<8x128xf32>
    tpu.vector_store %arg6[%c0_21, %c0_22], %44 {strides = array<i32>} : memref<8x128xf32, #tpu.memory_space<vmem>>, vector<8x128xf32>,
    return
  }
}

</mosaic_0001>

<bundles_post_ra>
// kernel: tpu_custom_call.1
= control target key start
LH: loop header
LB: loop body
LE: loop exit
PB: predicated region body
PF: predicated region fallthrough
CT: control target
= control target key end

     0   :  { %11 = vsyncpa [#allocation3], 0  ;;  %s2178_s0 = inlined_call_operand.hbm [shape: f32[64,128], index: 0, kind: input, shape index: {}]   ;;  %s2179_s1 = inlined_call_operand.hbm [shape: f32[128,128], index: 1, kind: input, shape index: {}]   ;;  %s2180_s2 = inlined_call_operand.hbm [shape: f32[128,128], index: 2, kind: input, shape index: {}]   ;;  %s2181_s3 = inlined_call_operand.vmem [shape: f32[1,128], index: 3, kind: input, shape index: {}]   ;;  %s2182_s4 = inlined_call_operand.hbm [shape: f32[128,128], index: 4, kind: input, shape index: {}]   ;;  %s2183_s5 = inlined_call_operand.vmem [shape: f32[1,128], index: 5, kind: input, shape index: {}]   ;;  %s2184_s6 = inlined_call_operand.hbm [shape: f32[8,128], index: 6, kind: output, shape index: {}]  }
   0x1   :  { %12 = vsyncpa [#allocation6], 0 }
   0x2   :  { %13 = vsyncpa [#allocation9], 0 }
   0x3   :  { %14 = vsyncpa [#allocation4], 0  ;;  %s1848_s21 = smov [#allocation5]   ;;  %s1849_s23 = smov [#allocation2]  }
   0x4   :  { %s32_s22 = sshll.u32 %s1848_s21, 4  ;;  %s20_s24 = sshll.u32 %s1849_s23, 4  ;;  %s33_s22 = int_to_ptr.vmem [resolvable:$true] %s32_s22  ;;  %s1893_s24 = int_to_ptr.vmem [resolvable:$true] %s20_s24 }
   0x5   :  { %s1730_s27 = scalar_lea.hbm %s2179_s1, 2048 }
   0x6   :  { %p1731_p0 = scmp.ne.s32.totalorder %s2179_s1, %s1730_s27  ;;  %p1734_p1 = scmp.lt.u32.totalorder %s1730_s27, %s2179_s1 }
   0x8   :  { %p1736_p2 = pnand %p1734_p1, %p1731_p0 }
   0xa   :  { %1739 = shalt.err (!%p1736_p2)
}
   0xb   :  { %s1740_s8 = scalar_lea.vmem %s33_s22, 2048  ;;  %p1745_p4 = scmp.lt.s32.totalorder %s33_s22, %s33_s22 }
   0xc   :  { %p1741_p3 = scmp.ne.s32.totalorder %s33_s22, %s1740_s8  ;;  %p1746_p5 = scmp.lt.s32.totalorder %s1740_s8, %s1740_s8 }
   0xe   :  { %p1747_p6 = por %p1746_p5, %p1745_p4 }
  0x10   :  { %p1748_p7 = pnand %p1747_p6, %p1741_p3 }
  0x12   :  { %1751 = shalt.err (!%p1748_p7)
}
  0x13   :  { %s1850_s9 = smov 128   ;;  %s1851_s10 = smov 8  }
  0x14   :  { %38 = dma.hbm_to_vmem [thread:$0]  %s2179_s1, 2048, %s33_s22, [#allocation6], %s1850_s9, %s1850_s9, %s1851_s10  }
  0x15   :  { %s1752_s15 = scalar_lea.hbm %s2178_s0, 1024 }
  0x16   :  { %p1753_p8 = scmp.ne.s32.totalorder %s2178_s0, %s1752_s15  ;;  %p1756_p9 = scmp.lt.u32.totalorder %s1752_s15, %s2178_s0 }
  0x18   :  { %p1758_p10 = pnand %p1756_p9, %p1753_p8 }
  0x1a   :  { %1761 = shalt.err (!%p1758_p10)
}
  0x1b   :  { %s1762_s20 = scalar_lea.vmem %s1893_s24, 1024  ;;  %p1767_p12 = scmp.lt.s32.totalorder %s1893_s24, %s1893_s24 }
  0x1c   :  { %p1763_p11 = scmp.ne.s32.totalorder %s1893_s24, %s1762_s20  ;;  %p1768_p13 = scmp.lt.s32.totalorder %s1762_s20, %s1762_s20 }
  0x1e   :  { %p1769_p0 = por %p1768_p13, %p1767_p12 }
  0x20   :  { %p1770_p1 = pnand %p1769_p0, %p1763_p11 }
  0x22   :  { %1773 = shalt.err (!%p1770_p1)
}
  0x23   :  { %26 = dma.hbm_to_vmem [thread:$0]  %s2178_s0, 1024, %s1893_s24, [#allocation3], %s1850_s9, %s1850_s9, %s1851_s10  }
  0x24   :  { %s1852_s22 = smov [#allocation7]   ;;  %s1853_s25 = smov [#allocation8]  }
  0x25   :  { %s44_s23 = sshll.u32 %s1852_s22, 4  ;;  %s58_s26 = sshll.u32 %s1853_s25, 4  ;;  %s45_s23 = int_to_ptr.vmem [resolvable:$true] %s44_s23  ;;  %s1930_s26 = int_to_ptr.vmem [resolvable:$true] %s58_s26 }
  0x26   :  { %s1774_s29 = scalar_lea.hbm %s2180_s2, 2048 }
  0x27   :  { %p1775_p2 = scmp.ne.s32.totalorder %s2180_s2, %s1774_s29  ;;  %p1778_p3 = scmp.lt.u32.totalorder %s1774_s29, %s2180_s2 }
  0x29   :  { %p1780_p4 = pnand %p1778_p3, %p1775_p2 }
  0x2b   :  { %1783 = shalt.err (!%p1780_p4)
}
  0x2c   :  { %s1784_s0 = scalar_lea.vmem %s45_s23, 2048  ;;  %p1789_p6 = scmp.lt.s32.totalorder %s45_s23, %s45_s23 }
  0x2d   :  { %p1785_p5 = scmp.ne.s32.totalorder %s45_s23, %s1784_s0  ;;  %p1790_p7 = scmp.lt.s32.totalorder %s1784_s0, %s1784_s0 }
  0x2f   :  { %p1791_p8 = por %p1790_p7, %p1789_p6 }
  0x31   :  { %p1792_p9 = pnand %p1791_p8, %p1785_p5 }
  0x33   :  { %1795 = shalt.err (!%p1792_p9)
}
  0x34   :  { %50 = dma.hbm_to_vmem [thread:$0]  %s2180_s2, 2048, %s45_s23, [#allocation6], %s1850_s9, %s1850_s9, %s1851_s10  }
  0x35   :  { %s1796_s15 = scalar_lea.hbm %s2182_s4, 2048 }
  0x36   :  { %p1797_p10 = scmp.ne.s32.totalorder %s2182_s4, %s1796_s15  ;;  %p1800_p11 = scmp.lt.u32.totalorder %s1796_s15, %s2182_s4 }
  0x38   :  { %p1802_p12 = pnand %p1800_p11, %p1797_p10 }
  0x3a   :  { %1805 = shalt.err (!%p1802_p12)
}
  0x3b   :  { %s1806_s20 = scalar_lea.vmem %s1930_s26, 2048  ;;  %p1811_p0 = scmp.lt.s32.totalorder %s1930_s26, %s1930_s26 }
  0x3c   :  { %p1807_p13 = scmp.ne.s32.totalorder %s1930_s26, %s1806_s20  ;;  %p1812_p1 = scmp.lt.s32.totalorder %s1806_s20, %s1806_s20 }
  0x3e   :  { %p1813_p2 = por %p1812_p1, %p1811_p0 }
  0x40   :  { %p1814_p3 = pnand %p1813_p2, %p1807_p13 }
  0x42   :  { %1817 = shalt.err (!%p1814_p3)
}
  0x43   :  { %64 = dma.hbm_to_vmem [thread:$0]  %s2182_s4, 2048, %s1930_s26, [#allocation9], %s1850_s9, %s1850_s9, %s1851_s10  }
  0x44   :  { %1840 = dma.done.wait [#allocation3], 1024  }
  0x45   :  { %1841 = vsyncadd [#allocation3], 4294966272 }
  0x46   :  { %1842 = dma.done.wait [#allocation6], 4096  }
  0x47   :  { %1843 = vsyncadd [#allocation6], 4294963200 }
  0x48   :  { %1844 = dma.done.wait [#allocation9], 2048  }
  0x49   :  { %1845 = vsyncadd [#allocation9], 4294965248  ;;  %v1854_v0 = vmov 0.0|0.0   ;;  %vm1855_vm0 = vmmov 0   ;;  %v1856_v1 = vmov 0.0   ;;  %v104_v2 = vld [vmem:[#allocation5] sm:$0xff] }
  0x4a   :  { %1488 = vmatprep.subr.bf16.mxu1 %v1854_v0  ;;  %1173 = vmatprep.mubr.msk.f32.mxu1 %vm1855_vm0, %v1856_v1  ;;  %v105_v3 = vld [vmem:[#allocation5 + $0x8] sm:$0xff]  ;;  %v80_v4 = vld [vmem:[#allocation7] sm:$0xff]  ;;  %v106_v7 = vld [vmem:[#allocation5 + $0x10] sm:$0xff]  ;;  %s1857_s21 = smov [#allocation10]  }
  0x4b   :  { %v1456_v5 = vpack.c.bf16 %v105_v3, %v104_v2  ;;  %v81_v6 = vld [vmem:[#allocation7 + $0x8] sm:$0xff]  ;;  %v107_v8 = vld [vmem:[#allocation5 + $0x18] sm:$0xff]  ;;  %v82_v11 = vld [vmem:[#allocation7 + $0x10] sm:$0xff]  ;;  %s907_s22 = sshll.u32 %s1857_s21, 4  ;;  %s908_s22 = int_to_ptr.vmem [resolvable:$true] %s907_s22 }
  0x4c   :  { %v1970_v9 = vpack.c.bf16 %v81_v6, %v80_v4  ;;  %v1460_v10 = vpack.c.bf16 %v107_v8, %v106_v7  ;;  %v83_v12 = vld [vmem:[#allocation7 + $0x18] sm:$0xff]  ;;  %v108_v13 = vld [vmem:[#allocation5 + $0x20] sm:$0xff]  ;;  %v109_v14 = vld [vmem:[#allocation5 + $0x28] sm:$0xff]  ;;  %s1818_s23 = scalar_lea.vmem %s908_s22, 128  ;;  %p1823_p5 = scmp.lt.s32.totalorder %s908_s22, %s908_s22 }
  0x4d   :  { %1457 = vmatprep.subr.bf16.mxu0 %v1456_v5  ;;  %v1973_v15 = vpack.c.bf16 %v83_v12, %v82_v11  ;;  %v1464_v16 = vpack.c.bf16 %v109_v14, %v108_v13  ;;  %v84_v17 = vld [vmem:[#allocation7 + $0x20] sm:$0xff]  ;;  %v85_v18 = vld [vmem:[#allocation7 + $0x28] sm:$0xff]  ;;  %v110_v19 = vld [vmem:[#allocation5 + $0x30] sm:$0xff]  ;;  %p1819_p4 = scmp.ne.s32.totalorder %s908_s22, %s1818_s23  ;;  %p1824_p6 = scmp.lt.s32.totalorder %s1818_s23, %s1818_s23 }
  0x4e   :  { %1459 = vmatpush3.bf16.msra.mxu0 %v1456_v5  ;;  %1490 = vmatpush3.bf16.msra.mxu1 %v1970_v9  ;;  %v111_v20 = vld [vmem:[#allocation5 + $0x38] sm:$0xff]  ;;  %v1977_v21 = vpack.c.bf16 %v85_v18, %v84_v17  ;;  %v86_v23 = vld [vmem:[#allocation7 + $0x30] sm:$0xff]  ;;  %v112_v25 = vld [vmem:[#allocation5 + $0x40] sm:$0xff] }
  0x4f   :  { %1461 = vmatprep.subr.bf16.mxu0 %v1460_v10  ;;  %1491 = vmatprep.subr.bf16.mxu1 %v1854_v0  ;;  %v1468_v22 = vpack.c.bf16 %v111_v20, %v110_v19  ;;  %v87_v24 = vld [vmem:[#allocation7 + $0x38] sm:$0xff]  ;;  %v113_v26 = vld [vmem:[#allocation5 + $0x48] sm:$0xff]  ;;  %v96_v27 = vld [vmem:[#allocation2] sm:$0xff]  ;;  %p1825_p7 = por %p1824_p6, %p1823_p5 }
  0x50   :  { %1129 = vmatprep.mubr.f32.mxu0 %v96_v27  ;;  %v1981_v28 = vpack.c.bf16 %v87_v24, %v86_v23  ;;  %v1472_v29 = vpack.c.bf16 %v113_v26, %v112_v25  ;;  %v88_v30 = vld [vmem:[#allocation7 + $0x40] sm:$0xff]  ;;  %v89_v31 = vld [vmem:[#allocation7 + $0x48] sm:$0xff]  ;;  %v114_v32 = vld [vmem:[#allocation5 + $0x50] sm:$0xff] }
  0x51   :  { %v115_v33 = vld [vmem:[#allocation5 + $0x58] sm:$0xff]  ;;  %v1985_v34 = vpack.c.bf16 %v89_v31, %v88_v30  ;;  %v90_v36 = vld [vmem:[#allocation7 + $0x50] sm:$0xff]  ;;  %v116_v38 = vld [vmem:[#allocation5 + $0x60] sm:$0xff]  ;;  %p1826_p8 = pnand %p1825_p7, %p1819_p4 }
  0x52   :  { %1463 = vmatpush3.bf16.msra.mxu0 %v1460_v10  ;;  %1493 = vmatpush3.bf16.msra.mxu1 %v1973_v15  ;;  %v1476_v35 = vpack.c.bf16 %v115_v33, %v114_v32  ;;  %v91_v37 = vld [vmem:[#allocation7 + $0x58] sm:$0xff]  ;;  %v117_v39 = vld [vmem:[#allocation5 + $0x68] sm:$0xff]  ;;  %v92_v42 = vld [vmem:[#allocation7 + $0x60] sm:$0xff] }
  0x53   :  { %1465 = vmatprep.subr.bf16.mxu0 %v1464_v16  ;;  %1494 = vmatprep.subr.bf16.mxu1 %v1854_v0  ;;  %v1989_v40 = vpack.c.bf16 %v91_v37, %v90_v36  ;;  %v1480_v41 = vpack.c.bf16 %v117_v39, %v116_v38  ;;  %v93_v43 = vld [vmem:[#allocation7 + $0x68] sm:$0xff]  ;;  %v118_v44 = vld [vmem:[#allocation5 + $0x70] sm:$0xff]  ;;  %v119_v45 = vld [vmem:[#allocation5 + $0x78] sm:$0xff] }
  0x54   :  { %v1993_v46 = vpack.c.bf16 %v93_v43, %v92_v42  ;;  %v1484_v47 = vpack.c.bf16 %v119_v45, %v118_v44  ;;  %v94_v48 = vld [vmem:[#allocation7 + $0x70] sm:$0xff]  ;;  %v95_v49 = vld [vmem:[#allocation7 + $0x78] sm:$0xff]  ;;  %v97_v51 = vld [vmem:[#allocation2 + $0x8] sm:$0xff] }
  0x55   :  { %v1997_v50 = vpack.c.bf16 %v95_v49, %v94_v48  ;;  %v98_v52 = vld [vmem:[#allocation2 + $0x10] sm:$0xff]  ;;  %v99_v53 = vld [vmem:[#allocation2 + $0x18] sm:$0xff]  ;;  %v100_v54 = vld [vmem:[#allocation2 + $0x20] sm:$0xff] }
  0x56   :  { %1467 = vmatpush3.bf16.msra.mxu0 %v1464_v16  ;;  %1496 = vmatpush3.bf16.msra.mxu1 %v1977_v21  ;;  %v101_v55 = vld [vmem:[#allocation2 + $0x28] sm:$0xff]  ;;  %v102_v56 = vld [vmem:[#allocation2 + $0x30] sm:$0xff]  ;;  %v103_v57 = vld [vmem:[#allocation2 + $0x38] sm:$0xff] }
  0x57   :  { %1469 = vmatprep.subr.bf16.mxu0 %v1468_v22  ;;  %1497 = vmatprep.subr.bf16.mxu1 %v1854_v0  ;;  %v2043_v58 = vld [vmem:[%s2181_s3] ss:$0 sm:$0xff]  ;;  %v808_v36 = vld [vmem:[#allocation8 + $0x8] sm:$0xff]  ;;  %v809_v37 = vld [vmem:[#allocation8 + $0x10] sm:$0xff] }
  0x58   :  { %v810_v39 = vld [vmem:[#allocation8 + $0x18] sm:$0xff]  ;;  %v812_v42 = vld [vmem:[#allocation8 + $0x28] sm:$0xff]  ;;  %v813_v44 = vld [vmem:[#allocation8 + $0x30] sm:$0xff] }
  0x59   :  { %v814_v45 = vld [vmem:[#allocation8 + $0x38] sm:$0xff] }
  0x5a   :  { %1471 = vmatpush3.bf16.msra.mxu0 %v1468_v22  ;;  %1499 = vmatpush3.bf16.msra.mxu1 %v1981_v28 }
  0x5b   :  { %1473 = vmatprep.subr.bf16.mxu0 %v1472_v29  ;;  %1500 = vmatprep.subr.bf16.mxu1 %v1854_v0 }
  0x5e   :  { %1475 = vmatpush3.bf16.msra.mxu0 %v1472_v29  ;;  %1502 = vmatpush3.bf16.msra.mxu1 %v1985_v34 }
  0x5f   :  { %1477 = vmatprep.subr.bf16.mxu0 %v1476_v35  ;;  %1503 = vmatprep.subr.bf16.mxu1 %v1854_v0 }
  0x62   :  { %1479 = vmatpush3.bf16.msra.mxu0 %v1476_v35  ;;  %1505 = vmatpush3.bf16.msra.mxu1 %v1989_v40  ;;  %v807_v35 = vld [vmem:[#allocation8] sm:$0xff] }
  0x63   :  { %1481 = vmatprep.subr.bf16.mxu0 %v1480_v41  ;;  %1506 = vmatprep.subr.bf16.mxu1 %v1854_v0  ;;  %v1681_v38 = vpack.c.bf16 %v808_v36, %v807_v35 }
  0x66   :  { %1483 = vmatpush3.bf16.msra.mxu0 %v1480_v41  ;;  %1508 = vmatpush3.bf16.msra.mxu1 %v1993_v46  ;;  %v811_v41 = vld [vmem:[#allocation8 + $0x20] sm:$0xff] }
  0x67   :  { %1485 = vmatprep.subr.bf16.mxu0 %v1484_v47  ;;  %1509 = vmatprep.subr.bf16.mxu1 %v1854_v0  ;;  %v1687_v43 = vpack.c.bf16 %v812_v42, %v811_v41 }
  0x6a   :  { %1487 = vmatpush3.bf16.msra.mxu0 %v1484_v47  ;;  %1511 = vmatpush3.bf16.msra.mxu1 %v1997_v50  ;;  %v816_v47 = vld [vmem:[#allocation8 + $0x48] sm:$0xff] }
  0x6b   :  { %1512 = vmatprep.subr.bf16.mxu0 %v1854_v0  ;;  %1536 = vmatprep.subr.bf16.mxu1 %v1854_v0 }
  0x6d   :  { %1130 = vmatmul.mubr.f32.vlgmr.msra.gmra.mrb[0].mxu0 %v97_v51  ;;  %1174 = vmatmul.mubr.f32.vlgmr.msra.gmra.mrb[0].mxu1 %v1856_v1 }
  0x6e   :  { %1514 = vmatpush3.bf16.msra.mxu0 %v1970_v9  ;;  %1538 = vmatpush3.bf16.msra.mxu1 %v1970_v9 }
  0x6f   :  { %1515 = vmatprep.subr.bf16.mxu0 %v1854_v0  ;;  %1539 = vmatprep.subr.bf16.mxu1 %v1854_v0 }
  0x70   :  { %1243 = vmatprep.mubr.msk.f32.mxu1 %vm1855_vm0, %v1856_v1  ;;  %1132 = vmatprep.mubr.f32.mxu0 %v98_v52 }
  0x71   :  { %1133 = vmatmul.mubr.f32.gmra.mrb[2].mxu0 %v99_v53 }
  0x72   :  { %1517 = vmatpush3.bf16.msra.mxu0 %v1973_v15  ;;  %1541 = vmatpush3.bf16.msra.mxu1 %v1973_v15 }
  0x73   :  { %1518 = vmatprep.subr.bf16.mxu0 %v1854_v0  ;;  %1542 = vmatprep.subr.bf16.mxu1 %v1854_v0 }
  0x74   :  { %1135 = vmatprep.mubr.f32.mxu0 %v100_v54  ;;  %v817_v54 = vld [vmem:[#allocation8 + $0x50] sm:$0xff] }
  0x75   :  { %1136 = vmatmul.mubr.f32.gmra.mrb[4].mxu0 %v101_v55  ;;  %v818_v55 = vld [vmem:[#allocation8 + $0x58] sm:$0xff] }
  0x76   :  { %1520 = vmatpush3.bf16.msra.mxu0 %v1977_v21  ;;  %1544 = vmatpush3.bf16.msra.mxu1 %v1977_v21 }
  0x77   :  { %1521 = vmatprep.subr.bf16.mxu0 %v1854_v0  ;;  %1545 = vmatprep.subr.bf16.mxu1 %v1854_v0 }
  0x78   :  { %1138 = vmatprep.mubr.f32.mxu0 %v102_v56  ;;  %v1696_v56 = vpack.c.bf16 %v818_v55, %v817_v54 }
  0x79   :  { %1139 = vmatmul.mubr.f32.gmra.mrb[6].mxu0 %v103_v57  ;;  %v819_v57 = vld [vmem:[#allocation8 + $0x60] sm:$0xff] }
  0x7a   :  { %1523 = vmatpush3.bf16.msra.mxu0 %v1981_v28  ;;  %1547 = vmatpush3.bf16.msra.mxu1 %v1981_v28 }
  0x7b   :  { %1524 = vmatprep.subr.bf16.mxu0 %v1854_v0  ;;  %1548 = vmatprep.subr.bf16.mxu1 %v1854_v0 }
  0x7c   :  { %1208 = vmatprep.mubr.msk.f32.mxu0 %vm1855_vm0, %v1856_v1 }
  0x7e   :  { %1526 = vmatpush3.bf16.msra.mxu0 %v1985_v34  ;;  %1550 = vmatpush3.bf16.msra.mxu1 %v1985_v34 }
  0x7f   :  { %1527 = vmatprep.subr.bf16.mxu0 %v1854_v0  ;;  %1551 = vmatprep.subr.bf16.mxu1 %v1854_v0 }
  0x82   :  { %1529 = vmatpush3.bf16.msra.mxu0 %v1989_v40  ;;  %1553 = vmatpush3.bf16.msra.mxu1 %v1989_v40 }
  0x83   :  { %1530 = vmatprep.subr.bf16.mxu0 %v1854_v0  ;;  %1554 = vmatprep.subr.bf16.mxu1 %v1854_v0 }
  0x86   :  { %1532 = vmatpush3.bf16.msra.mxu0 %v1993_v46  ;;  %1556 = vmatpush3.bf16.msra.mxu1 %v1993_v46 }
  0x87   :  { %1533 = vmatprep.subr.bf16.mxu0 %v1854_v0  ;;  %1557 = vmatprep.subr.bf16.mxu1 %v1854_v0 }
  0x8a   :  { %1535 = vmatpush3.bf16.msra.mxu0 %v1997_v50  ;;  %1559 = vmatpush3.bf16.msra.mxu1 %v1997_v50 }
  0x8b   :  { %1560 = vmatprep.subr.bf16.mxu0 %v1854_v0  ;;  %1584 = vmatprep.subr.bf16.mxu1 %v1854_v0 }
 0x140   :  { %v1131_v59 = vpop.f32.mrb[0].mxu0  ;;  %v297_v60 = vpop.f32.mrb[0].mxu1 }
 0x141   :  { %v192_v61 = vpop.f32.mrb[1].mxu0  ;;  %v1175_v62 = vpop.f32.mrb[1].mxu1  ;;  %v198_v11 = vadd.f32 %v1131_v59, %v2043_v58  ;;  %v820_v59 = vld [vmem:[#allocation8 + $0x68] sm:$0xff] }
 0x142   :  { %v193_v63 = vadd.f32 %v2043_v58, %v192_v61  ;;  %v821_v61 = vld [vmem:[#allocation8 + $0x70] sm:$0xff]  ;;  %v822_v62 = vld [vmem:[#allocation8 + $0x78] sm:$0xff] }
 0x144   :  { %v301_v2 = vadd.f32 %v297_v60, %v193_v63  ;;  %v1134_v4 = vpop.f32.mrb[2].mxu0  ;;  %v1699_v60 = vpack.c.bf16 %v820_v59, %v819_v57  ;;  %v1702_v63 = vpack.c.bf16 %v822_v62, %v821_v61 }
 0x145   :  { %v202_v5 = vpop.f32.mrb[3].mxu0  ;;  %v208_v23 = vadd.f32 %v1134_v4, %v2043_v58 }
 0x146   :  { %1714 = vtanh.f32 %v301_v2  ;;  %v203_v17 = vadd.f32 %v2043_v58, %v202_v5 }
 0x148   :  { %v2064_v6 = vpop.f32.mrb[4].mxu0 }
 0x149   :  { %v2066_v7 = vpop.f32.mrb[5].mxu0 }
 0x14a   :  { %v213_v29 = vadd.f32 %v2043_v58, %v2066_v7  ;;  %v919_v7 = vld [vmem:[%s2183_s5] ss:$0 sm:$0xff] }
 0x14c   :  { %v2068_v8 = vpop.f32.mrb[6].mxu0 }
 0x14d   :  { %v2070_v10 = vpop.f32.mrb[7].mxu0  ;;  %v228_v2 = vadd.f32 %v2068_v8, %v2043_v58 }
 0x14e   :  { %v223_v49 = vadd.f32 %v2043_v58, %v2070_v10 }
 0x150   :  { %v1715_v3 = vpop.eup %1714 }
 0x151   :  { %1209 = vmatmul.mubr.f32.vlgmr.msra.gmra.mrb[8].mxu0 %v1715_v3 }
 0x152   :  { %1562 = vmatpush3.bf16.msra.mxu0 %v1970_v9  ;;  %1278 = vmatprep.mubr.msk.f32.mxu0 %vm1855_vm0, %v1856_v1 }
 0x153   :  { %1563 = vmatprep.subr.bf16.mxu0 %v1854_v0 }
 0x156   :  { %1565 = vmatpush3.bf16.msra.mxu0 %v1973_v15 }
 0x157   :  { %1566 = vmatprep.subr.bf16.mxu0 %v1854_v0 }
 0x15a   :  { %1568 = vmatpush3.bf16.msra.mxu0 %v1977_v21 }
 0x15b   :  { %1569 = vmatprep.subr.bf16.mxu0 %v1854_v0 }
 0x15e   :  { %1571 = vmatpush3.bf16.msra.mxu0 %v1981_v28 }
 0x15f   :  { %1572 = vmatprep.subr.bf16.mxu0 %v1854_v0 }
 0x162   :  { %1574 = vmatpush3.bf16.msra.mxu0 %v1985_v34 }
 0x163   :  { %1575 = vmatprep.subr.bf16.mxu0 %v1854_v0 }
 0x166   :  { %1577 = vmatpush3.bf16.msra.mxu0 %v1989_v40 }
 0x167   :  { %1578 = vmatprep.subr.bf16.mxu0 %v1854_v0 }
 0x16a   :  { %1580 = vmatpush3.bf16.msra.mxu0 %v1993_v46 }
 0x16b   :  { %1581 = vmatprep.subr.bf16.mxu0 %v1854_v0 }
 0x16e   :  { %1583 = vmatpush3.bf16.msra.mxu0 %v1997_v50 }
 0x16f   :  { %1608 = vmatprep.subr.bf16.mxu0 %v1854_v0 }
 0x224   :  { %v369_v12 = vpop.f32.mrb[8].mxu0 }
 0x225   :  { %v373_v13 = vadd.f32 %v369_v12, %v198_v11  ;;  %v1210_v14 = vpop.f32.mrb[9].mxu0 }
 0x227   :  { %1716 = vtanh.f32 %v373_v13 }
 0x231   :  { %v1717_v16 = vpop.eup %1716 }
 0x232   :  { %1244 = vmatmul.mubr.f32.vlgmr.msra.gmra.mrb[2].mxu1 %v1717_v16 }
 0x233   :  { %1586 = vmatpush3.bf16.msra.mxu1 %v1970_v9  ;;  %1313 = vmatprep.mubr.msk.f32.mxu1 %vm1855_vm0, %v1856_v1 }
 0x234   :  { %1587 = vmatprep.subr.bf16.mxu1 %v1854_v0 }
 0x237   :  { %1589 = vmatpush3.bf16.msra.mxu1 %v1973_v15 }
 0x238   :  { %1590 = vmatprep.subr.bf16.mxu1 %v1854_v0 }
 0x23b   :  { %1592 = vmatpush3.bf16.msra.mxu1 %v1977_v21 }
 0x23c   :  { %1593 = vmatprep.subr.bf16.mxu1 %v1854_v0 }
 0x23f   :  { %1595 = vmatpush3.bf16.msra.mxu1 %v1981_v28 }
 0x240   :  { %1596 = vmatprep.subr.bf16.mxu1 %v1854_v0 }
 0x243   :  { %1598 = vmatpush3.bf16.msra.mxu1 %v1985_v34 }
 0x244   :  { %1599 = vmatprep.subr.bf16.mxu1 %v1854_v0 }
 0x247   :  { %1601 = vmatpush3.bf16.msra.mxu1 %v1989_v40 }
 0x248   :  { %1602 = vmatprep.subr.bf16.mxu1 %v1854_v0 }
 0x24b   :  { %1604 = vmatpush3.bf16.msra.mxu1 %v1993_v46 }
 0x24c   :  { %1605 = vmatprep.subr.bf16.mxu1 %v1854_v0 }
 0x24f   :  { %1607 = vmatpush3.bf16.msra.mxu1 %v1997_v50 }
 0x250   :  { %1632 = vmatprep.subr.bf16.mxu1 %v1854_v0 }
 0x305   :  { %v441_v18 = vpop.f32.mrb[2].mxu1 }
 0x306   :  { %v445_v19 = vadd.f32 %v441_v18, %v203_v17  ;;  %v1245_v20 = vpop.f32.mrb[3].mxu1 }
 0x308   :  { %1718 = vtanh.f32 %v445_v19 }
 0x312   :  { %v1719_v22 = vpop.eup %1718 }
 0x313   :  { %1279 = vmatmul.mubr.f32.vlgmr.msra.gmra.mrb[10].mxu0 %v1719_v22 }
 0x314   :  { %1610 = vmatpush3.bf16.msra.mxu0 %v1970_v9  ;;  %1348 = vmatprep.mubr.msk.f32.mxu0 %vm1855_vm0, %v1856_v1 }
 0x315   :  { %1611 = vmatprep.subr.bf16.mxu0 %v1854_v0 }
 0x318   :  { %1613 = vmatpush3.bf16.msra.mxu0 %v1973_v15 }
 0x319   :  { %1614 = vmatprep.subr.bf16.mxu0 %v1854_v0 }
 0x31c   :  { %1616 = vmatpush3.bf16.msra.mxu0 %v1977_v21 }
 0x31d   :  { %1617 = vmatprep.subr.bf16.mxu0 %v1854_v0 }
 0x320   :  { %1619 = vmatpush3.bf16.msra.mxu0 %v1981_v28 }
 0x321   :  { %1620 = vmatprep.subr.bf16.mxu0 %v1854_v0 }
 0x324   :  { %1622 = vmatpush3.bf16.msra.mxu0 %v1985_v34 }
 0x325   :  { %1623 = vmatprep.subr.bf16.mxu0 %v1854_v0 }
 0x328   :  { %1625 = vmatpush3.bf16.msra.mxu0 %v1989_v40 }
 0x329   :  { %1626 = vmatprep.subr.bf16.mxu0 %v1854_v0 }
 0x32c   :  { %1628 = vmatpush3.bf16.msra.mxu0 %v1993_v46 }
 0x32d   :  { %1629 = vmatprep.subr.bf16.mxu0 %v1854_v0 }
 0x330   :  { %1631 = vmatpush3.bf16.msra.mxu0 %v1997_v50 }
 0x331   :  { %1656 = vmatprep.subr.bf16.mxu0 %v1854_v0 }
 0x3e6   :  { %v513_v24 = vpop.f32.mrb[10].mxu0 }
 0x3e7   :  { %v517_v25 = vadd.f32 %v513_v24, %v208_v23  ;;  %v1280_v26 = vpop.f32.mrb[11].mxu0 }
 0x3e9   :  { %1720 = vtanh.f32 %v517_v25 }
 0x3f3   :  { %v1721_v27 = vpop.eup %1720 }
 0x3f4   :  { %1314 = vmatmul.mubr.f32.vlgmr.msra.gmra.mrb[4].mxu1 %v1721_v27 }
 0x3f5   :  { %1634 = vmatpush3.bf16.msra.mxu1 %v1970_v9  ;;  %1383 = vmatprep.mubr.msk.f32.mxu1 %vm1855_vm0, %v1856_v1 }
 0x3f6   :  { %1635 = vmatprep.subr.bf16.mxu1 %v1854_v0 }
 0x3f9   :  { %1637 = vmatpush3.bf16.msra.mxu1 %v1973_v15 }
 0x3fa   :  { %1638 = vmatprep.subr.bf16.mxu1 %v1854_v0 }
 0x3fd   :  { %1640 = vmatpush3.bf16.msra.mxu1 %v1977_v21 }
 0x3fe   :  { %1641 = vmatprep.subr.bf16.mxu1 %v1854_v0 }
 0x401   :  { %1643 = vmatpush3.bf16.msra.mxu1 %v1981_v28 }
 0x402   :  { %1644 = vmatprep.subr.bf16.mxu1 %v1854_v0 }
 0x405   :  { %1646 = vmatpush3.bf16.msra.mxu1 %v1985_v34 }
 0x406   :  { %1647 = vmatprep.subr.bf16.mxu1 %v1854_v0 }
 0x409   :  { %1649 = vmatpush3.bf16.msra.mxu1 %v1989_v40 }
 0x40a   :  { %1650 = vmatprep.subr.bf16.mxu1 %v1854_v0 }
 0x40d   :  { %1652 = vmatpush3.bf16.msra.mxu1 %v1993_v46 }
 0x40e   :  { %1653 = vmatprep.subr.bf16.mxu1 %v1854_v0 }
 0x411   :  { %1655 = vmatpush3.bf16.msra.mxu1 %v1997_v50 }
 0x412   :  { %1680 = vmatprep.subr.bf16.mxu1 %v1854_v0 }
 0x4c7   :  { %v585_v30 = vpop.f32.mrb[4].mxu1 }
 0x4c8   :  { %v589_v31 = vadd.f32 %v585_v30, %v213_v29  ;;  %v1315_v32 = vpop.f32.mrb[5].mxu1 }
 0x4ca   :  { %1722 = vtanh.f32 %v589_v31 }
 0x4d4   :  { %v1723_v33 = vpop.eup %1722 }
 0x4d5   :  { %1349 = vmatmul.mubr.f32.vlgmr.msra.gmra.mrb[12].mxu0 %v1723_v33 }
 0x4d6   :  { %1658 = vmatpush3.bf16.msra.mxu0 %v1970_v9  ;;  %1418 = vmatprep.mubr.msk.f32.mxu0 %vm1855_vm0, %v1856_v1  ;;  %v218_v9 = vadd.f32 %v2064_v6, %v2043_v58 }
 0x4d7   :  { %1659 = vmatprep.subr.bf16.mxu0 %v1854_v0 }
 0x4da   :  { %1661 = vmatpush3.bf16.msra.mxu0 %v1973_v15 }
 0x4db   :  { %1662 = vmatprep.subr.bf16.mxu0 %v1854_v0 }
 0x4de   :  { %1664 = vmatpush3.bf16.msra.mxu0 %v1977_v21 }
 0x4df   :  { %1665 = vmatprep.subr.bf16.mxu0 %v1854_v0 }
 0x4e2   :  { %1667 = vmatpush3.bf16.msra.mxu0 %v1981_v28 }
 0x4e3   :  { %1668 = vmatprep.subr.bf16.mxu0 %v1854_v0 }
 0x4e6   :  { %1670 = vmatpush3.bf16.msra.mxu0 %v1985_v34 }
 0x4e7   :  { %1671 = vmatprep.subr.bf16.mxu0 %v1854_v0 }
 0x4ea   :  { %1673 = vmatpush3.bf16.msra.mxu0 %v1989_v40  ;;  %v1684_v40 = vpack.c.bf16 %v810_v39, %v809_v37 }
 0x4eb   :  { %1674 = vmatprep.subr.bf16.mxu0 %v1854_v0 }
 0x4ee   :  { %1676 = vmatpush3.bf16.msra.mxu0 %v1993_v46  ;;  %v1690_v46 = vpack.c.bf16 %v814_v45, %v813_v44 }
 0x4ef   :  { %1677 = vmatprep.subr.bf16.mxu0 %v1854_v0 }
 0x4f2   :  { %1679 = vmatpush3.bf16.msra.mxu0 %v1997_v50 }
 0x5a8   :  { %v657_v15 = vpop.f32.mrb[12].mxu0 }
 0x5a9   :  { %v661_v21 = vadd.f32 %v657_v15, %v218_v9  ;;  %v1350_v28 = vpop.f32.mrb[13].mxu0 }
 0x5ab   :  { %1724 = vtanh.f32 %v661_v21 }
 0x5b5   :  { %v1725_v34 = vpop.eup %1724 }
 0x5b6   :  { %1384 = vmatmul.mubr.f32.vlgmr.msra.gmra.mrb[6].mxu1 %v1725_v34 }
 0x5b7   :  { %1453 = vmatprep.mubr.msk.f32.mxu1 %vm1855_vm0, %v1856_v1  ;;  %1682 = vmatpush3.bf16.msra.mxu1 %v1681_v38  ;;  %v815_v1 = vld [vmem:[#allocation8 + $0x40] sm:$0xff] }
 0x5b8   :  { %1683 = vmatprep.subr.bf16.mxu1 %v1854_v0  ;;  %v1693_v48 = vpack.c.bf16 %v816_v47, %v815_v1 }
 0x5bb   :  { %1685 = vmatpush3.bf16.msra.mxu1 %v1684_v40 }
 0x5bc   :  { %1686 = vmatprep.subr.bf16.mxu1 %v1854_v0 }
 0x5bf   :  { %1688 = vmatpush3.bf16.msra.mxu1 %v1687_v43 }
 0x5c0   :  { %1689 = vmatprep.subr.bf16.mxu1 %v1854_v0 }
 0x5c3   :  { %1691 = vmatpush3.bf16.msra.mxu1 %v1690_v46 }
 0x5c4   :  { %1692 = vmatprep.subr.bf16.mxu1 %v1854_v0 }
 0x5c7   :  { %1694 = vmatpush3.bf16.msra.mxu1 %v1693_v48 }
 0x5c8   :  { %1695 = vmatprep.subr.bf16.mxu1 %v1854_v0 }
 0x5cb   :  { %1697 = vmatpush3.bf16.msra.mxu1 %v1696_v56 }
 0x5cc   :  { %1698 = vmatprep.subr.bf16.mxu1 %v1854_v0 }
 0x5cf   :  { %1700 = vmatpush3.bf16.msra.mxu1 %v1699_v60 }
 0x5d0   :  { %1701 = vmatprep.subr.bf16.mxu1 %v1854_v0 }
 0x5d3   :  { %1703 = vmatpush3.bf16.msra.mxu1 %v1702_v63 }
 0x689   :  { %v729_v50 = vpop.f32.mrb[6].mxu1 }
 0x68a   :  { %v733_v51 = vadd.f32 %v729_v50, %v223_v49  ;;  %v1385_v52 = vpop.f32.mrb[7].mxu1 }
 0x68c   :  { %1726 = vtanh.f32 %v733_v51 }
 0x696   :  { %v1727_v53 = vpop.eup %1726 }
 0x697   :  { %1419 = vmatmul.mubr.f32.vlgmr.msra.gmra.mrb[14].mxu0 %v1727_v53 }
 0x76a   :  { %v801_v3 = vpop.f32.mrb[14].mxu0 }
 0x76b   :  { %v805_v4 = vadd.f32 %v801_v3, %v228_v2  ;;  %v1420_v5 = vpop.f32.mrb[15].mxu0 }
 0x76d   :  { %1728 = vtanh.f32 %v805_v4 }
 0x777   :  { %v1729_v6 = vpop.eup %1728 }
 0x778   :  { %1454 = vmatmul.mubr.f32.vlgmr.msra.gmra.mrb[8].mxu1 %v1729_v6 }
 0x84b   :  { %v896_v10 = vpop.f32.mrb[8].mxu1 }
 0x84c   :  { %v897_v11 = vadd.f32 %v919_v7, %v896_v10  ;;  %v1455_v12 = vpop.f32.mrb[9].mxu1 }
 0x84e   :  { %900 = vst [vmem:[#allocation10] sm:$0xff] %v897_v11 }
 0x84f   :  { %1829 = shalt.err (!%p1826_p8)
}
 0x850   :  { %s1830_s27 = scalar_lea.hbm %s2184_s6, 128 }
 0x851   :  { %p1831_p9 = scmp.ne.s32.totalorder %s2184_s6, %s1830_s27  ;;  %p1834_p10 = scmp.lt.u32.totalorder %s1830_s27, %s2184_s6 }
 0x853   :  { %p1836_p11 = pnand %p1834_p10, %p1831_p9 }
 0x855   :  { %1839 = shalt.err (!%p1836_p11)
}
 0x856   :  { %910 = dma.vmem_to_hbm [thread:$0]  %s908_s22, 128, %s2184_s6, [#allocation4]  }
 0x857   :  { %1846 = dma.done.wait [#allocation4], 128  }
 0x858   :  { %1847 = vsyncadd [#allocation4], 4294967168 }
 0x859   :  { %914 = vsyncpa [#allocation3], 1 }
 0x85a   :  { %915 = vsyncpa [#allocation6], 1 }
 0x85b   :  { %916 = vsyncpa [#allocation9], 1 }
 0x85c   :  { %917 = vsyncpa [#allocation4], 1 }

</bundles_post_ra>
